<compile_context>
chip_gen: v7x
topology: tpu7x:2x2x1
jax: 0.10.0
libtpu: 0.0.40
codegen_flags: <defaults>
</compile_context>

<pallas_src>
import math

import jax
import jax.numpy as jnp
from jax.experimental import pallas as pl
from jax.experimental.pallas import tpu as pltpu

# ---- problem sizes (small, consistent with the module) ----
B = 2          # batch
T = 8          # sequence length
D_MODEL = 32   # d_model
HEADS = 2      # attention heads
D_K = 16       # key dim per head
D_V = 16       # value dim per head
D_FF = 64      # feed-forward dim


def _layer_norm(x, gamma, beta, eps=1e-6):
    mean = jnp.mean(x, axis=-1, keepdims=True)
    var = jnp.mean((x - mean) ** 2, axis=-1, keepdims=True)
    return (x - mean) * jax.lax.rsqrt(var + eps) * gamma + beta


# -----------------------------------------------------------------------------
# Host-side weight preparation: fuse QKV, pre-transpose, pack into ONE buffer.
# Matrices are padded to 8-row multiples; the seven 1-row bias/LN vectors are
# packed contiguously so they all land inside one sublane-tile-aligned group.
# -----------------------------------------------------------------------------
def _prep_weights(params):
    """Returns (packed_f32_buffer, layout) with layout[name] = (row0, nrows, ncols)."""
    H, dm, _ = params["w_q"].shape

    def heads_to_cols(w):  # (H, dm, d) -> (dm, H*d), columns ordered head0|head1|...
        return jnp.transpose(w, (1, 0, 2)).reshape(dm, -1)

    # Fused QKV projection weight: columns = [q heads | k heads | v heads]
    w_qkv = jnp.concatenate(
        [heads_to_cols(params["w_q"]),
         heads_to_cols(params["w_k"]),
         heads_to_cols(params["w_v"])], axis=-1)           # (dm, 2*H*dk + H*dv)

    mats = [
        ("w_qkv", w_qkv),           # (dm, 2*H*dk + H*dv)
        ("w_o", params["w_o"].T),   # (H*dv, dm), pre-transposed, per-head row order
        ("w1", params["w1"].T),     # (dm, dff)
        ("w2", params["w2"].T),     # (dff, dm)
    ]
    vecs = [
        ("b_o", params["b_o"]), ("b1", params["b1"]), ("b2", params["b2"]),
        ("ln1_g", params["ln1_g"]), ("ln1_b", params["ln1_b"]),
        ("ln2_g", params["ln2_g"]), ("ln2_b", params["ln2_b"]),
    ]

    max_nc = max(int(a.shape[1]) for _, a in mats + vecs)
    pack_cols = max(128, 128 * ((max_nc + 127) // 128))    # lane-aligned width

    layout = {}
    rows = []
    r = 0
    # Matrices, each padded to an 8-row multiple (sublane-tile-aligned starts).
    for name, a in mats:
        a = jnp.asarray(a, jnp.float32)
        nr, nc = int(a.shape[0]), int(a.shape[1])
        layout[name] = (r, nr, nc)
        pad_r = (-nr) % 8
        rows.append(jnp.pad(a, ((0, pad_r), (0, pack_cols - nc))))
        r += nr + pad_r
    # 1-row bias / LayerNorm vectors: contiguous group starting on a tile row.
    for name, a in vecs:
        a = jnp.asarray(a, jnp.float32)
        nr, nc = int(a.shape[0]), int(a.shape[1])
        layout[name] = (r, nr, nc)
        rows.append(jnp.pad(a, ((0, 0), (0, pack_cols - nc))))
        r += nr
    packed = jnp.concatenate(rows, axis=0)
    pad_total = (-packed.shape[0]) % 8
    if pad_total:
        packed = jnp.pad(packed, ((0, pad_total), (0, 0)))
    return packed, layout


# -----------------------------------------------------------------------------
# Kernel: whole batch in one grid step, position-wise work on a (B*T, dm) slab.
# -----------------------------------------------------------------------------
def _build_kernel(layout, bsz, Tlen, dm, H, dk, dv, dff):
    inv_dk = 1.0 / float(dk)
    q_off, k_off, v_off = 0, H * dk, 2 * H * dk

    def kernel(mask_ref, x_ref, w_ref, out_ref, cat_ref):
        # Parameter slices are taken at their USE sites (views of the single
        # packed buffer) to keep live ranges short.
        def get(name):
            r0, nr, nc = layout[name]
            return w_ref[r0:r0 + nr, 0:nc]

        x = x_ref[...]                                     # (B*T, dm) f32 slab

        # ---- fused QKV projection: ONE matmul for all batches and heads ----
        qkv = jnp.dot(x, get("w_qkv"),
                      preferred_element_type=jnp.float32)  # (B*T, 2*H*dk + H*dv)

        # ---- per (batch, head) attention; outputs stacked into cat_ref ----
        for i in range(bsz):                 # static unroll (tiny trip count)
            m = mask_ref[i].astype(jnp.float32)            # (1, T)
            mask2d = m.T * m                               # (T, T): mask[i]*mask[j]
            r0, r1 = i * Tlen, (i + 1) * Tlen              # sublane-aligned rows
            for h in range(H):
                q = qkv[r0:r1, q_off + h * dk: q_off + (h + 1) * dk]
                k = qkv[r0:r1, k_off + h * dk: k_off + (h + 1) * dk]
                v = qkv[r0:r1, v_off + h * dv: v_off + (h + 1) * dv]

                # scores = q @ k^T / d_k  (reference divides by d_k, not sqrt)
                scores = jax.lax.dot_general(
                    q, k, (((1,), (1,)), ((), ())),
                    preferred_element_type=jnp.float32) * inv_dk
                scores = scores * mask2d
                scores = jnp.where(scores == 0.0, 1e-10, scores)

                # softmax over last dim (max-shifted, exact divide)
                scores = scores - jnp.max(scores, axis=-1, keepdims=True)
                e = jnp.exp(scores)
                attn = e / jnp.sum(e, axis=-1, keepdims=True)

                head_out = jnp.dot(attn, v, preferred_element_type=jnp.float32)
                # Stack heads at lane offset h*dv (within one lane tile).
                cat_ref[r0:r1, h * dv:(h + 1) * dv] = head_out

        # ---- output projection: ONE (B*T, H*dv) @ (H*dv, dm) matmul ----
        proj = jnp.dot(cat_ref[...], get("w_o"),
                       preferred_element_type=jnp.float32) + get("b_o")

        # ---- AddNorm[0]: layer_norm(residual + attention_out) ----
        y1 = _layer_norm(x + proj, get("ln1_g"), get("ln1_b"))

        # ---- position-wise FFN over the whole slab (weights are (in, out)) ----
        h1 = jnp.maximum(
            jnp.dot(y1, get("w1"), preferred_element_type=jnp.float32) + get("b1"),
            0.0)
        h2 = jnp.dot(h1, get("w2"), preferred_element_type=jnp.float32) + get("b2")

        # ---- AddNorm[1]: layer_norm(residual + ffn_out) ----
        y2 = _layer_norm(y1 + h2, get("ln2_g"), get("ln2_b"))
        out_ref[...] = y2.astype(out_ref.dtype)            # single full-block store

    return kernel


# -----------------------------------------------------------------------------
# Wrapper
# -----------------------------------------------------------------------------
def encoder_forward(x, src_mask, params):
    """x: (B, T, d_model) f32;  src_mask: (B, T) f32 of {0,1}."""
    Bsz, Tlen, dm = x.shape
    H, _, dk = params["w_q"].shape
    dv = params["w_v"].shape[-1]
    dff = params["w1"].shape[0]

    packed, layout = _prep_weights(params)
    x_slab = x.reshape(Bsz * Tlen, dm).astype(jnp.float32)       # (B*T, dm)
    mask3 = src_mask.reshape(Bsz, 1, Tlen).astype(jnp.float32)   # (B, 1, T)

    kernel = _build_kernel(layout, Bsz, Tlen, dm, H, dk, dv, dff)

    # Single grid step for the whole batch on every chip generation: at this
    # size the kernel is launch/DMA-overhead bound, so a v7x megacore split
    # over B=2 would only replicate the weight DMA + prologue per core.
    grid_spec = pltpu.PrefetchScalarGridSpec(
        num_scalar_prefetch=0,
        grid=(1,),
        in_specs=[
            pl.BlockSpec((Bsz, 1, Tlen), lambda i: (0, 0, 0)),      # src_mask
            pl.BlockSpec((Bsz * Tlen, dm), lambda i: (0, 0)),       # x slab
            pl.BlockSpec(packed.shape, lambda i: (0, 0)),           # packed weights
        ],
        out_specs=pl.BlockSpec((Bsz * Tlen, dm), lambda i: (0, 0)),
        scratch_shapes=[pltpu.VMEM((Bsz * Tlen, H * dv), jnp.float32)],
    )

    out = pl.pallas_call(
        kernel,
        out_shape=jax.ShapeDtypeStruct((Bsz * Tlen, dm), jnp.float32),
        grid_spec=grid_spec,
        compiler_params=pltpu.CompilerParams(
            dimension_semantics=("arbitrary",)),
    )(mask3, x_slab, packed)
    return out.reshape(Bsz, Tlen, dm)


# -----------------------------------------------------------------------------
# Parameter init (matches the PyTorch module's init conventions)
# -----------------------------------------------------------------------------
def init_params(key):
    ks = jax.random.split(key, 8)
    std_k = 1.0 / math.sqrt(D_K)
    std_v = 1.0 / math.sqrt(D_V)
    return {
        # multi-head attention projections (num_heads, d_model, d_k/d_v)
        "w_q": std_k * jax.random.normal(ks[0], (HEADS, D_MODEL, D_K), jnp.float32),
        "w_k": std_k * jax.random.normal(ks[1], (HEADS, D_MODEL, D_K), jnp.float32),
        "w_v": std_v * jax.random.normal(ks[2], (HEADS, D_MODEL, D_V), jnp.float32),
        # output projection nn.Linear(H*d_v, d_model): weight (out, in)
        "w_o": (1.0 / math.sqrt(HEADS * D_V)) *
               jax.random.normal(ks[3], (D_MODEL, HEADS * D_V), jnp.float32),
        "b_o": jnp.zeros((1, D_MODEL), jnp.float32),
        # FFN linears: weight (out, in)
        "w1": (1.0 / math.sqrt(D_MODEL)) *
              jax.random.normal(ks[4], (D_FF, D_MODEL), jnp.float32),
        "b1": 0.01 * jax.random.normal(ks[5], (1, D_FF), jnp.float32),
        "w2": (1.0 / math.sqrt(D_FF)) *
              jax.random.normal(ks[6], (D_MODEL, D_FF), jnp.float32),
        "b2": 0.01 * jax.random.normal(ks[7], (1, D_MODEL), jnp.float32),
        # LayerNorm affine params (init 1 / 0 like nn.LayerNorm)
        "ln1_g": jnp.ones((1, D_MODEL), jnp.float32),
        "ln1_b": jnp.zeros((1, D_MODEL), jnp.float32),
        "ln2_g": jnp.ones((1, D_MODEL), jnp.float32),
        "ln2_b": jnp.zeros((1, D_MODEL), jnp.float32),
    }


# -----------------------------------------------------------------------------
# Pure-JAX reference (same semantics as the PyTorch module, eval mode)
# -----------------------------------------------------------------------------
def encoder_reference(x, src_mask, params):
    q = jnp.einsum("btd,hdk->bhtk", x, params["w_q"])
    k = jnp.einsum("btd,hdk->bhtk", x, params["w_k"])
    v = jnp.einsum("btd,hdk->bhtk", x, params["w_v"])
    scores = jnp.einsum("bhik,bhjk->bhij", q, k) / float(D_K)
    m2 = src_mask[:, None, :, None] * src_mask[:, None, None, :]
    scores = scores * m2
    scores = jnp.where(scores == 0.0, 1e-10, scores)
    attn = jax.nn.softmax(scores, axis=-1)
    out = jnp.einsum("bhij,bhjd->bhid", attn, v)
    concat = jnp.transpose(out, (0, 2, 1, 3)).reshape(x.shape[0], x.shape[1], -1)
    proj = concat @ params["w_o"].T + params["b_o"]
    y1 = _layer_norm(x + proj, params["ln1_g"], params["ln1_b"])
    h1 = jnp.maximum(y1 @ params["w1"].T + params["b1"], 0.0)
    h2 = h1 @ params["w2"].T + params["b2"]
    return _layer_norm(y1 + h2, params["ln2_g"], params["ln2_b"])


if __name__ == "__main__":
    key = jax.random.PRNGKey(0)
    k_x, k_p = jax.random.split(key)

    x = jax.random.normal(k_x, (B, T, D_MODEL), jnp.float32)
    # src_mask: 1 = keep, 0 = pad (pad out the last two positions of batch 0)
    src_mask = jnp.ones((B, T), jnp.float32).at[0, -2:].set(0.0)

    params = init_params(k_p)

    out = encoder_forward(x, src_mask, params)
    out = jax.block_until_ready(out)

    with jax.default_matmul_precision("highest"):
        ref = encoder_reference(x, src_mask, params)

    assert out.shape == (B, T, D_MODEL)
    assert jnp.all(jnp.isfinite(out))
    assert jnp.allclose(out, ref, atol=1e-2, rtol=1e-2), \
        float(jnp.max(jnp.abs(out - ref)))
    print("KERNEL_OK")
</pallas_src>

<mosaic_0001>
module attributes {stable_mosaic.version = 11 : i64} {
  func.func @kernel(%arg0: i32, %arg1: memref<2x1x8xf32, #tpu.memory_space<vmem>>, %arg2: memref<16x32xf32, #tpu.memory_space<vmem>>, %arg3: memref<168x128xf32, #tpu.memory_space<vmem>>, %arg4: memref<16x32xf32, #tpu.memory_space<vmem>>, %arg5: memref<16x32xf32, #tpu.memory_space<vmem>>) attributes {dimension_semantics = [#tpu.dimension_semantics<arbitrary>], iteration_bounds = array<i64: 1>, scalar_prefetch = 0 : i64, scratch_operands = 1 : i64, tpu.core_type = #tpu.core_type<tc>, window_params = [{pipeline_mode = #tpu.pipeline_mode<synchronous>, transform_indices = @transform_0, window_bounds = array<i64: 2, 1, 8>}, {pipeline_mode = #tpu.pipeline_mode<synchronous>, transform_indices = @transform_1, window_bounds = array<i64: 16, 32>}, {pipeline_mode = #tpu.pipeline_mode<synchronous>, transform_indices = @transform_2, window_bounds = array<i64: 168, 128>}, {pipeline_mode = #tpu.pipeline_mode<synchronous>, transform_indices = @transform_3, window_bounds = array<i64: 16, 32>}]} {
    %c0 = arith.constant 0 : index
    %c0_0 = arith.constant 0 : index
    %0 = vector.load %arg2[%c0, %c0_0] : memref<16x32xf32, #tpu.memory_space<vmem>>, vector<16x32xf32>
    %c0_1 = arith.constant 0 : index
    %c0_2 = arith.constant 0 : index
    %1 = vector.load %arg3[%c0_1, %c0_2] : memref<168x128xf32, #tpu.memory_space<vmem>>, vector<32x96xf32>
    %cst = arith.constant dense<0.000000e+00> : vector<16x96xf32>
    %2 = tpu.matmul %0, %1, %cst {dimension_numbers = #tpu.dot_dimension_numbers<[1], [0], [0], [1], [0, 0, 1, 1], [], []>} : vector<16x32xf32>, vector<32x96xf32>, vector<16x96xf32> -> vector<16x96xf32>
    %c0_3 = arith.constant 0 : index
    %c0_4 = arith.constant 0 : index
    %c0_5 = arith.constant 0 : index
    %3 = vector.load %arg1[%c0_3, %c0_4, %c0_5] : memref<2x1x8xf32, #tpu.memory_space<vmem>>, vector<1x1x8xf32>
    %4 = vector.shape_cast %3 : vector<1x1x8xf32> to vector<1x8xf32>
    %5 = tpu.transpose %4, [1, 0] : vector<1x8xf32> -> vector<8x1xf32>
    %6 = vector.broadcast %5 : vector<8x1xf32> to vector<8x8xf32>
    %7 = vector.broadcast %4 : vector<1x8xf32> to vector<8x8xf32>
    %8 = arith.mulf %6, %7 : vector<8x8xf32>
    %9 = vector.extract_strided_slice %2 {offsets = [0, 0], sizes = [8, 16], strides = [1, 1]} : vector<16x96xf32> to vector<8x16xf32>
    %10 = vector.extract_strided_slice %2 {offsets = [0, 32], sizes = [8, 16], strides = [1, 1]} : vector<16x96xf32> to vector<8x16xf32>
    %11 = vector.extract_strided_slice %2 {offsets = [0, 64], sizes = [8, 16], strides = [1, 1]} : vector<16x96xf32> to vector<8x16xf32>
    %cst_6 = arith.constant dense<0.000000e+00> : vector<8x8xf32>
    %12 = tpu.matmul %9, %10, %cst_6 {dimension_numbers = #tpu.dot_dimension_numbers<[1], [1], [0], [0], [0, 0, 1, 0], [], []>} : vector<8x16xf32>, vector<8x16xf32>, vector<8x8xf32> -> vector<8x8xf32>
    %cst_7 = arith.constant 6.250000e-02 : f32
    %13 = vector.broadcast %cst_7 : f32 to vector<8x8xf32>
    %14 = arith.mulf %12, %13 : vector<8x8xf32>
    %15 = arith.mulf %14, %8 : vector<8x8xf32>
    %cst_8 = arith.constant 0.000000e+00 : f32
    %16 = vector.broadcast %cst_8 : f32 to vector<8x8xf32>
    %17 = arith.cmpf oeq, %15, %16 : vector<8x8xf32>
    %cst_9 = arith.constant 1.000000e-10 : f32
    %18 = vector.broadcast %cst_9 : f32 to vector<8x8xf32>
    %19 = arith.select %17, %18, %15 : vector<8x8xi1>, vector<8x8xf32>
    %cst_10 = arith.constant dense<0xFF800000> : vector<8xf32>
    %20 = vector.multi_reduction <maximumf>, %19, %cst_10 [1] : vector<8x8xf32> to vector<8xf32>
    %21 = vector.shape_cast %20 : vector<8xf32> to vector<8x1xf32>
    %22 = vector.broadcast %21 : vector<8x1xf32> to vector<8x8xf32>
    %23 = arith.subf %19, %22 : vector<8x8xf32>
    %24 = math.exp %23 : vector<8x8xf32>
    %cst_11 = arith.constant dense<0.000000e+00> : vector<8xf32>
    %25 = vector.multi_reduction <add>, %24, %cst_11 [1] : vector<8x8xf32> to vector<8xf32>
    %26 = vector.shape_cast %25 : vector<8xf32> to vector<8x1xf32>
    %27 = vector.broadcast %26 : vector<8x1xf32> to vector<8x8xf32>
    %28 = arith.divf %24, %27 : vector<8x8xf32>
    %cst_12 = arith.constant dense<0.000000e+00> : vector<8x16xf32>
    %29 = tpu.matmul %28, %11, %cst_12 {dimension_numbers = #tpu.dot_dimension_numbers<[1], [0], [0], [1], [0, 0, 1, 1], [], []>} : vector<8x8xf32>, vector<8x16xf32>, vector<8x16xf32> -> vector<8x16xf32>
    %c0_13 = arith.constant 0 : index
    %c0_14 = arith.constant 0 : index
    %30 = vector.load %arg5[%c0_13, %c0_14] : memref<16x32xf32, #tpu.memory_space<vmem>>, vector<8x16xf32>
    tpu.vector_store %arg5[%c0_13, %c0_14], %29 {strides = array<i32>} : memref<16x32xf32, #tpu.memory_space<vmem>>, vector<8x16xf32>,
    %31 = vector.extract_strided_slice %2 {offsets = [0, 16], sizes = [8, 16], strides = [1, 1]} : vector<16x96xf32> to vector<8x16xf32>
    %32 = vector.extract_strided_slice %2 {offsets = [0, 48], sizes = [8, 16], strides = [1, 1]} : vector<16x96xf32> to vector<8x16xf32>
    %33 = vector.extract_strided_slice %2 {offsets = [0, 80], sizes = [8, 16], strides = [1, 1]} : vector<16x96xf32> to vector<8x16xf32>
    %cst_15 = arith.constant dense<0.000000e+00> : vector<8x8xf32>
    %34 = tpu.matmul %31, %32, %cst_15 {dimension_numbers = #tpu.dot_dimension_numbers<[1], [1], [0], [0], [0, 0, 1, 0], [], []>} : vector<8x16xf32>, vector<8x16xf32>, vector<8x8xf32> -> vector<8x8xf32>
    %cst_16 = arith.constant 6.250000e-02 : f32
    %35 = vector.broadcast %cst_16 : f32 to vector<8x8xf32>
    %36 = arith.mulf %34, %35 : vector<8x8xf32>
    %37 = arith.mulf %36, %8 : vector<8x8xf32>
    %cst_17 = arith.constant 0.000000e+00 : f32
    %38 = vector.broadcast %cst_17 : f32 to vector<8x8xf32>
    %39 = arith.cmpf oeq, %37, %38 : vector<8x8xf32>
    %cst_18 = arith.constant 1.000000e-10 : f32
    %40 = vector.broadcast %cst_18 : f32 to vector<8x8xf32>
    %41 = arith.select %39, %40, %37 : vector<8x8xi1>, vector<8x8xf32>
    %cst_19 = arith.constant dense<0xFF800000> : vector<8xf32>
    %42 = vector.multi_reduction <maximumf>, %41, %cst_19 [1] : vector<8x8xf32> to vector<8xf32>
    %43 = vector.shape_cast %42 : vector<8xf32> to vector<8x1xf32>
    %44 = vector.broadcast %43 : vector<8x1xf32> to vector<8x8xf32>
    %45 = arith.subf %41, %44 : vector<8x8xf32>
    %46 = math.exp %45 : vector<8x8xf32>
    %cst_20 = arith.constant dense<0.000000e+00> : vector<8xf32>
    %47 = vector.multi_reduction <add>, %46, %cst_20 [1] : vector<8x8xf32> to vector<8xf32>
    %48 = vector.shape_cast %47 : vector<8xf32> to vector<8x1xf32>
    %49 = vector.broadcast %48 : vector<8x1xf32> to vector<8x8xf32>
    %50 = arith.divf %46, %49 : vector<8x8xf32>
    %cst_21 = arith.constant dense<0.000000e+00> : vector<8x16xf32>
    %51 = tpu.matmul %50, %33, %cst_21 {dimension_numbers = #tpu.dot_dimension_numbers<[1], [0], [0], [1], [0, 0, 1, 1], [], []>} : vector<8x8xf32>, vector<8x16xf32>, vector<8x16xf32> -> vector<8x16xf32>
    %c0_22 = arith.constant 0 : index
    %c16 = arith.constant 16 : index
    %52 = vector.load %arg5[%c0_22, %c16] : memref<16x32xf32, #tpu.memory_space<vmem>>, vector<8x16xf32>
    tpu.vector_store %arg5[%c0_22, %c16], %51 {strides = array<i32>} : memref<16x32xf32, #tpu.memory_space<vmem>>, vector<8x16xf32>,
    %c1 = arith.constant 1 : index
    %c0_23 = arith.constant 0 : index
    %c0_24 = arith.constant 0 : index
    %53 = vector.load %arg1[%c1, %c0_23, %c0_24] : memref<2x1x8xf32, #tpu.memory_space<vmem>>, vector<1x1x8xf32>
    %54 = vector.shape_cast %53 : vector<1x1x8xf32> to vector<1x8xf32>
    %55 = tpu.transpose %54, [1, 0] : vector<1x8xf32> -> vector<8x1xf32>
    %56 = vector.broadcast %55 : vector<8x1xf32> to vector<8x8xf32>
    %57 = vector.broadcast %54 : vector<1x8xf32> to vector<8x8xf32>
    %58 = arith.mulf %56, %57 : vector<8x8xf32>
    %59 = vector.extract_strided_slice %2 {offsets = [8, 0], sizes = [8, 16], strides = [1, 1]} : vector<16x96xf32> to vector<8x16xf32>
    %60 = vector.extract_strided_slice %2 {offsets = [8, 32], sizes = [8, 16], strides = [1, 1]} : vector<16x96xf32> to vector<8x16xf32>
    %61 = vector.extract_strided_slice %2 {offsets = [8, 64], sizes = [8, 16], strides = [1, 1]} : vector<16x96xf32> to vector<8x16xf32>
    %cst_25 = arith.constant dense<0.000000e+00> : vector<8x8xf32>
    %62 = tpu.matmul %59, %60, %cst_25 {dimension_numbers = #tpu.dot_dimension_numbers<[1], [1], [0], [0], [0, 0, 1, 0], [], []>} : vector<8x16xf32>, vector<8x16xf32>, vector<8x8xf32> -> vector<8x8xf32>
    %cst_26 = arith.constant 6.250000e-02 : f32
    %63 = vector.broadcast %cst_26 : f32 to vector<8x8xf32>
    %64 = arith.mulf %62, %63 : vector<8x8xf32>
    %65 = arith.mulf %64, %58 : vector<8x8xf32>
    %cst_27 = arith.constant 0.000000e+00 : f32
    %66 = vector.broadcast %cst_27 : f32 to vector<8x8xf32>
    %67 = arith.cmpf oeq, %65, %66 : vector<8x8xf32>
    %cst_28 = arith.constant 1.000000e-10 : f32
    %68 = vector.broadcast %cst_28 : f32 to vector<8x8xf32>
    %69 = arith.select %67, %68, %65 : vector<8x8xi1>, vector<8x8xf32>
    %cst_29 = arith.constant dense<0xFF800000> : vector<8xf32>
    %70 = vector.multi_reduction <maximumf>, %69, %cst_29 [1] : vector<8x8xf32> to vector<8xf32>
    %71 = vector.shape_cast %70 : vector<8xf32> to vector<8x1xf32>
    %72 = vector.broadcast %71 : vector<8x1xf32> to vector<8x8xf32>
    %73 = arith.subf %69, %72 : vector<8x8xf32>
    %74 = math.exp %73 : vector<8x8xf32>
    %cst_30 = arith.constant dense<0.000000e+00> : vector<8xf32>
    %75 = vector.multi_reduction <add>, %74, %cst_30 [1] : vector<8x8xf32> to vector<8xf32>
    %76 = vector.shape_cast %75 : vector<8xf32> to vector<8x1xf32>
    %77 = vector.broadcast %76 : vector<8x1xf32> to vector<8x8xf32>
    %78 = arith.divf %74, %77 : vector<8x8xf32>
    %cst_31 = arith.constant dense<0.000000e+00> : vector<8x16xf32>
    %79 = tpu.matmul %78, %61, %cst_31 {dimension_numbers = #tpu.dot_dimension_numbers<[1], [0], [0], [1], [0, 0, 1, 1], [], []>} : vector<8x8xf32>, vector<8x16xf32>, vector<8x16xf32> -> vector<8x16xf32>
    %c8 = arith.constant 8 : index
    %c0_32 = arith.constant 0 : index
    %80 = vector.load %arg5[%c8, %c0_32] : memref<16x32xf32, #tpu.memory_space<vmem>>, vector<8x16xf32>
    tpu.vector_store %arg5[%c8, %c0_32], %79 {strides = array<i32>} : memref<16x32xf32, #tpu.memory_space<vmem>>, vector<8x16xf32>,
    %81 = vector.extract_strided_slice %2 {offsets = [8, 16], sizes = [8, 16], strides = [1, 1]} : vector<16x96xf32> to vector<8x16xf32>
    %82 = vector.extract_strided_slice %2 {offsets = [8, 48], sizes = [8, 16], strides = [1, 1]} : vector<16x96xf32> to vector<8x16xf32>
    %83 = vector.extract_strided_slice %2 {offsets = [8, 80], sizes = [8, 16], strides = [1, 1]} : vector<16x96xf32> to vector<8x16xf32>
    %cst_33 = arith.constant dense<0.000000e+00> : vector<8x8xf32>
    %84 = tpu.matmul %81, %82, %cst_33 {dimension_numbers = #tpu.dot_dimension_numbers<[1], [1], [0], [0], [0, 0, 1, 0], [], []>} : vector<8x16xf32>, vector<8x16xf32>, vector<8x8xf32> -> vector<8x8xf32>
    %cst_34 = arith.constant 6.250000e-02 : f32
    %85 = vector.broadcast %cst_34 : f32 to vector<8x8xf32>
    %86 = arith.mulf %84, %85 : vector<8x8xf32>
    %87 = arith.mulf %86, %58 : vector<8x8xf32>
    %cst_35 = arith.constant 0.000000e+00 : f32
    %88 = vector.broadcast %cst_35 : f32 to vector<8x8xf32>
    %89 = arith.cmpf oeq, %87, %88 : vector<8x8xf32>
    %cst_36 = arith.constant 1.000000e-10 : f32
    %90 = vector.broadcast %cst_36 : f32 to vector<8x8xf32>
    %91 = arith.select %89, %90, %87 : vector<8x8xi1>, vector<8x8xf32>
    %cst_37 = arith.constant dense<0xFF800000> : vector<8xf32>
    %92 = vector.multi_reduction <maximumf>, %91, %cst_37 [1] : vector<8x8xf32> to vector<8xf32>
    %93 = vector.shape_cast %92 : vector<8xf32> to vector<8x1xf32>
    %94 = vector.broadcast %93 : vector<8x1xf32> to vector<8x8xf32>
    %95 = arith.subf %91, %94 : vector<8x8xf32>
    %96 = math.exp %95 : vector<8x8xf32>
    %cst_38 = arith.constant dense<0.000000e+00> : vector<8xf32>
    %97 = vector.multi_reduction <add>, %96, %cst_38 [1] : vector<8x8xf32> to vector<8xf32>
    %98 = vector.shape_cast %97 : vector<8xf32> to vector<8x1xf32>
    %99 = vector.broadcast %98 : vector<8x1xf32> to vector<8x8xf32>
    %100 = arith.divf %96, %99 : vector<8x8xf32>
    %cst_39 = arith.constant dense<0.000000e+00> : vector<8x16xf32>
    %101 = tpu.matmul %100, %83, %cst_39 {dimension_numbers = #tpu.dot_dimension_numbers<[1], [0], [0], [1], [0, 0, 1, 1], [], []>} : vector<8x8xf32>, vector<8x16xf32>, vector<8x16xf32> -> vector<8x16xf32>
    %c8_40 = arith.constant 8 : index
    %c16_41 = arith.constant 16 : index
    %102 = vector.load %arg5[%c8_40, %c16_41] : memref<16x32xf32, #tpu.memory_space<vmem>>, vector<8x16xf32>
    tpu.vector_store %arg5[%c8_40, %c16_41], %101 {strides = array<i32>} : memref<16x32xf32, #tpu.memory_space<vmem>>, vector<8x16xf32>,
    %c0_42 = arith.constant 0 : index
    %c0_43 = arith.constant 0 : index
    %103 = vector.load %arg5[%c0_42, %c0_43] : memref<16x32xf32, #tpu.memory_space<vmem>>, vector<16x32xf32>
    %c32 = arith.constant 32 : index
    %c0_44 = arith.constant 0 : index
    %104 = vector.load %arg3[%c32, %c0_44] : memref<168x128xf32, #tpu.memory_space<vmem>>, vector<32x32xf32>
    %cst_45 = arith.constant dense<0.000000e+00> : vector<16x32xf32>
    %105 = tpu.matmul %103, %104, %cst_45 {dimension_numbers = #tpu.dot_dimension_numbers<[1], [0], [0], [1], [0, 0, 1, 1], [], []>} : vector<16x32xf32>, vector<32x32xf32>, vector<16x32xf32> -> vector<16x32xf32>
    %c160 = arith.constant 160 : index
    %c0_46 = arith.constant 0 : index
    %106 = vector.load %arg3[%c160, %c0_46] : memref<168x128xf32, #tpu.memory_space<vmem>>, vector<1x32xf32>
    %107 = vector.broadcast %106 : vector<1x32xf32> to vector<16x32xf32>
    %108 = arith.addf %105, %107 : vector<16x32xf32>
    %109 = arith.addf %0, %108 : vector<16x32xf32>
    %c163 = arith.constant 163 : index
    %c0_47 = arith.constant 0 : index
    %110 = vector.load %arg3[%c163, %c0_47] : memref<168x128xf32, #tpu.memory_space<vmem>>, vector<1x32xf32>
    %c164 = arith.constant 164 : index
    %c0_48 = arith.constant 0 : index
    %111 = vector.load %arg3[%c164, %c0_48] : memref<168x128xf32, #tpu.memory_space<vmem>>, vector<1x32xf32>
    %cst_49 = arith.constant dense<0.000000e+00> : vector<16xf32>
    %112 = vector.multi_reduction <add>, %109, %cst_49 [1] : vector<16x32xf32> to vector<16xf32>
    %113 = vector.shape_cast %112 : vector<16xf32> to vector<16x1xf32>
    %cst_50 = arith.constant 3.200000e+01 : f32
    %114 = vector.broadcast %cst_50 : f32 to vector<16x1xf32>
    %115 = arith.divf %113, %114 : vector<16x1xf32>
    %116 = vector.broadcast %115 : vector<16x1xf32> to vector<16x32xf32>
    %117 = arith.subf %109, %116 : vector<16x32xf32>
    %118 = arith.mulf %117, %117 : vector<16x32xf32>
    %cst_51 = arith.constant dense<0.000000e+00> : vector<16xf32>
    %119 = vector.multi_reduction <add>, %118, %cst_51 [1] : vector<16x32xf32> to vector<16xf32>
    %120 = vector.shape_cast %119 : vector<16xf32> to vector<16x1xf32>
    %cst_52 = arith.constant 3.200000e+01 : f32
    %121 = vector.broadcast %cst_52 : f32 to vector<16x1xf32>
    %122 = arith.divf %120, %121 : vector<16x1xf32>
    %123 = vector.broadcast %115 : vector<16x1xf32> to vector<16x32xf32>
    %124 = arith.subf %109, %123 : vector<16x32xf32>
    %cst_53 = arith.constant 9.99999997E-7 : f32
    %125 = vector.broadcast %cst_53 : f32 to vector<16x1xf32>
    %126 = arith.addf %122, %125 : vector<16x1xf32>
    %127 = math.rsqrt %126 : vector<16x1xf32>
    %128 = vector.broadcast %127 : vector<16x1xf32> to vector<16x32xf32>
    %129 = arith.mulf %124, %128 : vector<16x32xf32>
    %130 = vector.broadcast %110 : vector<1x32xf32> to vector<16x32xf32>
    %131 = arith.mulf %129, %130 : vector<16x32xf32>
    %132 = vector.broadcast %111 : vector<1x32xf32> to vector<16x32xf32>
    %133 = arith.addf %131, %132 : vector<16x32xf32>
    %c64 = arith.constant 64 : index
    %c0_54 = arith.constant 0 : index
    %134 = vector.load %arg3[%c64, %c0_54] : memref<168x128xf32, #tpu.memory_space<vmem>>, vector<32x64xf32>
    %cst_55 = arith.constant dense<0.000000e+00> : vector<16x64xf32>
    %135 = tpu.matmul %133, %134, %cst_55 {dimension_numbers = #tpu.dot_dimension_numbers<[1], [0], [0], [1], [0, 0, 1, 1], [], []>} : vector<16x32xf32>, vector<32x64xf32>, vector<16x64xf32> -> vector<16x64xf32>
    %c161 = arith.constant 161 : index
    %c0_56 = arith.constant 0 : index
    %136 = vector.load %arg3[%c161, %c0_56] : memref<168x128xf32, #tpu.memory_space<vmem>>, vector<1x64xf32>
    %137 = vector.broadcast %136 : vector<1x64xf32> to vector<16x64xf32>
    %138 = arith.addf %135, %137 : vector<16x64xf32>
    %cst_57 = arith.constant 0.000000e+00 : f32
    %139 = vector.broadcast %cst_57 : f32 to vector<16x64xf32>
    %140 = arith.maximumf %138, %139 : vector<16x64xf32>
    %c96 = arith.constant 96 : index
    %c0_58 = arith.constant 0 : index
    %141 = vector.load %arg3[%c96, %c0_58] : memref<168x128xf32, #tpu.memory_space<vmem>>, vector<64x32xf32>
    %cst_59 = arith.constant dense<0.000000e+00> : vector<16x32xf32>
    %142 = tpu.matmul %140, %141, %cst_59 {dimension_numbers = #tpu.dot_dimension_numbers<[1], [0], [0], [1], [0, 0, 1, 1], [], []>} : vector<16x64xf32>, vector<64x32xf32>, vector<16x32xf32> -> vector<16x32xf32>
    %c162 = arith.constant 162 : index
    %c0_60 = arith.constant 0 : index
    %143 = vector.load %arg3[%c162, %c0_60] : memref<168x128xf32, #tpu.memory_space<vmem>>, vector<1x32xf32>
    %144 = vector.broadcast %143 : vector<1x32xf32> to vector<16x32xf32>
    %145 = arith.addf %142, %144 : vector<16x32xf32>
    %146 = arith.addf %133, %145 : vector<16x32xf32>
    %c165 = arith.constant 165 : index
    %c0_61 = arith.constant 0 : index
    %147 = vector.load %arg3[%c165, %c0_61] : memref<168x128xf32, #tpu.memory_space<vmem>>, vector<1x32xf32>
    %c166 = arith.constant 166 : index
    %c0_62 = arith.constant 0 : index
    %148 = vector.load %arg3[%c166, %c0_62] : memref<168x128xf32, #tpu.memory_space<vmem>>, vector<1x32xf32>
    %cst_63 = arith.constant dense<0.000000e+00> : vector<16xf32>
    %149 = vector.multi_reduction <add>, %146, %cst_63 [1] : vector<16x32xf32> to vector<16xf32>
    %150 = vector.shape_cast %149 : vector<16xf32> to vector<16x1xf32>
    %cst_64 = arith.constant 3.200000e+01 : f32
    %151 = vector.broadcast %cst_64 : f32 to vector<16x1xf32>
    %152 = arith.divf %150, %151 : vector<16x1xf32>
    %153 = vector.broadcast %152 : vector<16x1xf32> to vector<16x32xf32>
    %154 = arith.subf %146, %153 : vector<16x32xf32>
    %155 = arith.mulf %154, %154 : vector<16x32xf32>
    %cst_65 = arith.constant dense<0.000000e+00> : vector<16xf32>
    %156 = vector.multi_reduction <add>, %155, %cst_65 [1] : vector<16x32xf32> to vector<16xf32>
    %157 = vector.shape_cast %156 : vector<16xf32> to vector<16x1xf32>
    %cst_66 = arith.constant 3.200000e+01 : f32
    %158 = vector.broadcast %cst_66 : f32 to vector<16x1xf32>
    %159 = arith.divf %157, %158 : vector<16x1xf32>
    %160 = vector.broadcast %152 : vector<16x1xf32> to vector<16x32xf32>
    %161 = arith.subf %146, %160 : vector<16x32xf32>
    %cst_67 = arith.constant 9.99999997E-7 : f32
    %162 = vector.broadcast %cst_67 : f32 to vector<16x1xf32>
    %163 = arith.addf %159, %162 : vector<16x1xf32>
    %164 = math.rsqrt %163 : vector<16x1xf32>
    %165 = vector.broadcast %164 : vector<16x1xf32> to vector<16x32xf32>
    %166 = arith.mulf %161, %165 : vector<16x32xf32>
    %167 = vector.broadcast %147 : vector<1x32xf32> to vector<16x32xf32>
    %168 = arith.mulf %166, %167 : vector<16x32xf32>
    %169 = vector.broadcast %148 : vector<1x32xf32> to vector<16x32xf32>
    %170 = arith.addf %168, %169 : vector<16x32xf32>
    %c0_68 = arith.constant 0 : index
    %c0_69 = arith.constant 0 : index
    %171 = vector.load %arg4[%c0_68, %c0_69] : memref<16x32xf32, #tpu.memory_space<vmem>>, vector<16x32xf32>
    tpu.vector_store %arg4[%c0_68, %c0_69], %170 {strides = array<i32>} : memref<16x32xf32, #tpu.memory_space<vmem>>, vector<16x32xf32>,
    return
  }
  func.func @transform_0(%arg0: i32) -> (i32, i32, i32) {
    %c0_i32 = arith.constant 0 : i32
    %c0_i32_0 = arith.constant 0 : i32
    %c0_i32_1 = arith.constant 0 : i32
    %c0_i32_2 = arith.constant 0 : i32
    return %c0_i32, %c0_i32_0, %c0_i32_1 : i32, i32, i32
  }
  func.func @transform_1(%arg0: i32) -> (i32, i32) {
    %c0_i32 = arith.constant 0 : i32
    %c0_i32_0 = arith.constant 0 : i32
    %c0_i32_1 = arith.constant 0 : i32
    return %c0_i32, %c0_i32_0 : i32, i32
  }
  func.func @transform_2(%arg0: i32) -> (i32, i32) {
    %c0_i32 = arith.constant 0 : i32
    %c0_i32_0 = arith.constant 0 : i32
    %c0_i32_1 = arith.constant 0 : i32
    return %c0_i32, %c0_i32_0 : i32, i32
  }
  func.func @transform_3(%arg0: i32) -> (i32, i32) {
    %c0_i32 = arith.constant 0 : i32
    %c0_i32_0 = arith.constant 0 : i32
    %c0_i32_1 = arith.constant 0 : i32
    return %c0_i32, %c0_i32_0 : i32, i32
  }
}

</mosaic_0001>

<bundles_post_ra>
// kernel: tpu_custom_call.1
= control target key start
LH: loop header
LB: loop body
LE: loop exit
PB: predicated region body
PF: predicated region fallthrough
CT: control target
= control target key end

     0   :  { %8 = vsyncpa [#allocation4], 0  ;;  %s1832_s0 = inlined_call_operand.hbm [shape: f32[2,1,8], index: 0, kind: input, shape index: {}]   ;;  %s1833_s1 = inlined_call_operand.hbm [shape: f32[16,32], index: 1, kind: input, shape index: {}]   ;;  %s1834_s2 = inlined_call_operand.hbm [shape: f32[168,128], index: 2, kind: input, shape index: {}]   ;;  %s1835_s3 = inlined_call_operand.hbm [shape: f32[16,32], index: 3, kind: output, shape index: {}]  }
   0x1   :  { %9 = vsyncpa [#allocation7], 0 }
   0x2   :  { %10 = vsyncpa [#allocation5], 0  ;;  %s1647_s12 = smov [#allocation6]   ;;  %s1553_s16 = scalar_lea.hbm %s1833_s1, 256 }
   0x3   :  { %s28_s13 = sshll.u32 %s1647_s12, 4  ;;  %p1554_p0 = scmp.ne.s32.totalorder %s1833_s1, %s1553_s16  ;;  %s29_s13 = int_to_ptr.vmem [resolvable:$true] %s28_s13 }
   0x4   :  { %p1557_p1 = scmp.lt.u32.totalorder %s1553_s16, %s1833_s1 }
   0x6   :  { %p1559_p2 = pnand %p1557_p1, %p1554_p0 }
   0x8   :  { %1562 = shalt.err (!%p1559_p2)
}
   0x9   :  { %s1563_s21 = scalar_lea.vmem %s29_s13, 256  ;;  %p1568_p4 = scmp.lt.s32.totalorder %s29_s13, %s29_s13 }
   0xa   :  { %p1564_p3 = scmp.ne.s32.totalorder %s29_s13, %s1563_s21  ;;  %p1569_p5 = scmp.lt.s32.totalorder %s1563_s21, %s1563_s21 }
   0xc   :  { %p1570_p6 = por %p1569_p5, %p1568_p4 }
   0xe   :  { %p1571_p7 = pnand %p1570_p6, %p1564_p3 }
  0x10   :  { %1574 = shalt.err (!%p1571_p7)
}
  0x11   :  { %s1648_s22 = smov 128   ;;  %s1649_s23 = smov 8  }
  0x12   :  { %34 = dma.hbm_to_vmem [thread:$0]  %s1833_s1, 256, %s29_s13, [#allocation7], %s1648_s22, %s1648_s22, %s1649_s23  }
  0x13   :  { %s1650_s26 = smov [#allocation3]   ;;  %s1575_s30 = scalar_lea.hbm %s1832_s0, 32 }
  0x14   :  { %s16_s27 = sshll.u32 %s1650_s26, 4  ;;  %p1576_p8 = scmp.ne.s32.totalorder %s1832_s0, %s1575_s30  ;;  %s17_s27 = int_to_ptr.vmem [resolvable:$true] %s16_s27 }
  0x15   :  { %p1579_p9 = scmp.lt.u32.totalorder %s1575_s30, %s1832_s0 }
  0x17   :  { %p1581_p10 = pnand %p1579_p9, %p1576_p8 }
  0x19   :  { %1584 = shalt.err (!%p1581_p10)
}
  0x1a   :  { %s1585_s8 = scalar_lea.vmem %s17_s27, 32  ;;  %p1590_p12 = scmp.lt.s32.totalorder %s17_s27, %s17_s27 }
  0x1b   :  { %p1586_p11 = scmp.ne.s32.totalorder %s17_s27, %s1585_s8  ;;  %p1591_p13 = scmp.lt.s32.totalorder %s1585_s8, %s1585_s8 }
  0x1d   :  { %p1592_p0 = por %p1591_p13, %p1590_p12 }
  0x1f   :  { %p1593_p1 = pnand %p1592_p0, %p1586_p11 }
  0x21   :  { %1596 = shalt.err (!%p1593_p1)
}
  0x22   :  { %s1651_s1 = smov 16   ;;  %s1652_s9 = smov 1  }
  0x23   :  { %22 = dma.hbm_to_vmem [thread:$0]  %s1832_s0, 32, %s17_s27, [#allocation4], %s1651_s1, %s1651_s1, %s1652_s9  }
  0x24   :  { %s1653_s12 = smov [#allocation8]   ;;  %s1597_s16 = scalar_lea.hbm %s1834_s2, 2688 }
  0x25   :  { %s40_s13 = sshll.u32 %s1653_s12, 4  ;;  %p1598_p2 = scmp.ne.s32.totalorder %s1834_s2, %s1597_s16  ;;  %s41_s13 = int_to_ptr.vmem [resolvable:$true] %s40_s13 }
  0x26   :  { %p1601_p3 = scmp.lt.u32.totalorder %s1597_s16, %s1834_s2 }
  0x28   :  { %p1603_p4 = pnand %p1601_p3, %p1598_p2 }
  0x2a   :  { %1606 = shalt.err (!%p1603_p4)
}
  0x2b   :  { %s1607_s21 = scalar_lea.vmem %s41_s13, 2688  ;;  %p1612_p6 = scmp.lt.s32.totalorder %s41_s13, %s41_s13 }
  0x2c   :  { %p1608_p5 = scmp.ne.s32.totalorder %s41_s13, %s1607_s21  ;;  %p1613_p7 = scmp.lt.s32.totalorder %s1607_s21, %s1607_s21 }
  0x2e   :  { %p1614_p8 = por %p1613_p7, %p1612_p6 }
  0x30   :  { %p1615_p9 = pnand %p1614_p8, %p1608_p5 }
  0x32   :  { %1618 = shalt.err (!%p1615_p9)
}
  0x33   :  { %46 = dma.hbm_to_vmem [thread:$0]  %s1834_s2, 2688, %s41_s13, [#allocation7], %s1648_s22, %s1648_s22, %s1649_s23  }
  0x34   :  { %1641 = dma.done.wait [#allocation4], 32  }
  0x35   :  { %1642 = vsyncadd [#allocation4], 4294967264 }
  0x36   :  { %1643 = dma.done.wait [#allocation7], 2944  }
  0x37   :  { %1644 = vsyncadd [#allocation7], 4294964352  ;;  %vm62_vm0 = vcmask 261120   ;;  %v58_v0 = vld [vmem:[#allocation8] sm:$0xff]  ;;  %v59_v1 = vld [vmem:[#allocation8 + $0x8] sm:$0xff]  ;;  %v1654_v8 = vmov 0.0   ;;  %v183_v22 = vlaneseq }
  0x38   :  { %v60_v2 = vld [vmem:[#allocation8 + $0x10] sm:$0xff]  ;;  %v1471_v3 = vpack.c.bf16 %v59_v1, %v58_v0  ;;  %v61_v4 = vld [vmem:[#allocation8 + $0x18] sm:$0xff]  ;;  %1400 = vmatprep.subr.mxu0 %v1654_v8  ;;  %vm1655_vm1 = vmmov 0   ;;  %s1656_s2 = smov 112   ;;  %s1657_s25 = smov 96   ;;  %v1659_v13 = vmov 0  }
  0x39   :  { %v1727_v5 = vld [vmem:[#allocation6] sm:$0xff]  ;;  %v1475_v6 = vpack.c.bf16 %v61_v4, %v60_v2  ;;  %v1731_v7 = vld [vmem:[#allocation6 + $0x8] sm:$0xff]  ;;  %1402 = vmatprep.mubr.msk.f32.mxu0 %vm1655_vm1, %v1654_v8  ;;  %s1658_s26 = smov 80   ;;  %v144_v11 = vld [vmem:[#allocation3] sm:$0x1]  ;;  %vm192_vm2 = vcmask 130048  }
  0x3a   :  { %1387 = vmatprep.mubr.msk.f32.mxu1 %vm62_vm0, %v1727_v5  ;;  %1472 = vmatprep.subr.bf16.mxu1 %v1471_v3  ;;  %v536_v12 = vld [vmem:[#allocation3 + $0x1] sm:$0x1]  ;;  %v184_v23 = vshrl.u32 %v183_v22, 7  ;;  %vm271_vm3 = vcmask 64512   ;;  %s1660_s27 = smov 64   ;;  %s1661_s28 = smov 48  }
  0x3b   :  { %1474 = vmatpush3.bf16.msra.mxu1 %v1471_v3  ;;  %vm533_vm8 = vcmask 261248   ;;  %vm1164_vm9 = vcmask 523264   ;;  %s1662_s29 = smov [#allocation9]  }
  0x3c   :  { %1476 = vmatprep.subr.bf16.mxu1 %v1475_v6  ;;  %v185_v24 = vsub.s32 0, %v184_v23  ;;  %s1295_s30 = sshll.u32 %s1662_s29, 4  ;;  %s1296_s30 = int_to_ptr.vmem [resolvable:$true] %s1295_s30 }
  0x3d   :  { %s1619_s4 = scalar_lea.vmem %s1296_s30, 256  ;;  %p1624_p11 = scmp.lt.s32.totalorder %s1296_s30, %s1296_s30 }
  0x3e   :  { %v186_v25 = vrot.slane %v144_v11, %v185_v24  ;;  %v578_v31 = vrot.slane %v536_v12, %v185_v24  ;;  %p1620_p10 = scmp.ne.s32.totalorder %s1296_s30, %s1619_s4  ;;  %p1625_p12 = scmp.lt.s32.totalorder %s1619_s4, %s1619_s4 }
  0x3f   :  { %1478 = vmatpush3.bf16.msra.mxu1 %v1475_v6 }
  0x40   :  { %1390 = vmatprep.subr.mxu1 %v1654_v8  ;;  %p1626_p13 = por %p1625_p12, %p1624_p11 }
  0x42   :  { %1388 = vmatmul.mubr.msk.f32.vlgmr.msra.gmra.mrb[0].mxu1 %vm62_vm0, %v1731_v7  ;;  %p1627_p0 = pnand %p1626_p13, %p1620_p10 }
  0x43   :  { %1392 = vmatprep.mubr.msk.f32.mxu1 %vm1655_vm1, %v1654_v8 }
 0x115   :  { %v1741_v9 = vpop.f32.mrb[0].mxu1 }
 0x116   :  { %v1743_v10 = vpop.f32.mrb[1].mxu1 }
 0x117   :  { %360 = vrot.lane.b32.xlu1 %v1743_v10, %s1656_s2  ;;  %190 = vrot.lane.b32.xlu0 %v1743_v10, %s1657_s25 }
 0x11b   :  { %582 = vrot.lane.b32.xlu1 %v1741_v9, %s1657_s25  ;;  %362 = vrot.lane.b32.xlu0 %v1743_v10, %s1658_s26 }
 0x11f   :  { %750 = vrot.lane.b32.xlu1 %v1741_v9, %s1656_s2  ;;  %752 = vrot.lane.b32.xlu0 %v1741_v9, %s1658_s26 }
 0x13d   :  { %145 = vxpose.xlu0.b32.start.end [1/1] (short) (narrow) %v144_v11, 8 }
 0x148   :  { %537 = vxpose.xlu1.b32.start.end [1/1] (short) (narrow) %v536_v12, 8 }
 0x166   :  { %1527 = vset.pattern.permute.xlu0 %v1659_v13  ;;  %1528 = vset.pattern.permute.xlu1 %v1659_v13 }
 0x189   :  { %v191_v14 = vpop.permute.xlu0 %190  ;;  %v361_v15 = vpop.permute.xlu1 %360 }
 0x18a   :  { %1391 = vmatpush3.xpose.msk.msra.mxu1 %vm192_vm2, %v191_v14 }
 0x18b   :  { %1395 = vmatprep.subr.mxu1 %v1654_v8 }
 0x18d   :  { %1393 = vmatmul.mubr.msk.f32.vlgmr.msra.gmra.mrb[2].mxu1 %vm192_vm2, %v1743_v10  ;;  %v363_v16 = vpop.permute.xlu0 %362  ;;  %v583_v17 = vpop.permute.xlu1 %582 }
 0x18e   :  { %1401 = vmatpush3.xpose.msk.msra.mxu0 %vm192_vm2, %v363_v16  ;;  %1397 = vmatprep.mubr.msk.f32.mxu1 %vm1655_vm1, %v1654_v8 }
 0x18f   :  { %1410 = vmatprep.subr.mxu0 %v1654_v8 }
 0x191   :  { %1403 = vmatmul.mubr.msk.f32.vlgmr.msra.gmra.mrb[0].mxu0 %vm192_vm2, %v361_v15  ;;  %v753_v18 = vpop.permute.xlu0 %752  ;;  %v751_v19 = vpop.permute.xlu1 %750 }
 0x192   :  { %1411 = vmatpush3.xpose.msk.msra.mxu0 %vm192_vm2, %v583_v17  ;;  %1412 = vmatprep.mubr.msk.f32.mxu0 %vm1655_vm1, %v1654_v8 }
 0x193   :  { %1420 = vmatprep.subr.mxu0 %v1654_v8 }
 0x195   :  { %1413 = vmatmul.mubr.msk.f32.vlgmr.msra.gmra.mrb[2].mxu0 %vm192_vm2, %v1741_v9 }
 0x196   :  { %1421 = vmatpush3.xpose.msk.msra.mxu0 %vm192_vm2, %v753_v18  ;;  %1422 = vmatprep.mubr.msk.f32.mxu0 %vm1655_vm1, %v1654_v8 }
 0x199   :  { %1423 = vmatmul.mubr.msk.f32.vlgmr.msra.gmra.mrb[4].mxu0 %vm192_vm2, %v751_v19 }
 0x1bd   :  { %v161_v20 = vpop.trf.xlu0 }
 0x1be   :  { %179 = vperm.xlu0 %1527, %v161_v20  }
 0x1c8   :  { %v553_v21 = vpop.trf.xlu1 }
 0x1c9   :  { %571 = vperm.xlu1 %1528, %v553_v21  }
 0x23d   :  { %v180_v26 = vpop.permute.xlu0 %179 }
 0x23e   :  { %v188_v27 = vmul.f32 %v186_v25, %v180_v26 }
 0x248   :  { %v572_v34 = vpop.permute.xlu1 %571 }
 0x249   :  { %v580_v39 = vmul.f32 %v578_v31, %v572_v34  ;;  %v927_v31 = vld [vmem:[#allocation8 + $0x28] sm:$0xff]  ;;  %v928_v34 = vld [vmem:[#allocation8 + $0x30] sm:$0xff] }
 0x260   :  { %v263_v28 = vpop.f32.mrb[2].mxu1 }
 0x261   :  { %v267_v29 = vmul.f32 0.0625, %v263_v28  ;;  %v1394_v30 = vpop.f32.mrb[3].mxu1 }
 0x262   :  { %v926_v30 = vld [vmem:[#allocation8 + $0x20] sm:$0xff] }
 0x263   :  { %v268_v32 = vmul.f32 %v267_v29, %v188_v27 }
 0x264   :  { %v434_v33 = vpop.f32.mrb[0].mxu0 }
 0x265   :  { %v438_v35 = vmul.f32 0.0625, %v434_v33  ;;  %v1404_v36 = vpop.f32.mrb[1].mxu0  ;;  %vm269_vm4 = vcmp.eq.f32.partialorder %v268_v32, 0.0 }
 0x266   :  { %v270_v37 = vsel %vm269_vm4, 1e-10, %v268_v32  ;;  %v1479_v32 = vpack.c.bf16 %v927_v31, %v926_v30 }
 0x267   :  { %v439_v38 = vmul.f32 %v438_v35, %v188_v27  ;;  %v272_v40 = vsel %vm271_vm3, %v270_v37, -inf  ;;  %v929_v35 = vld [vmem:[#allocation8 + $0x38] sm:$0xff] }
 0x268   :  { %v654_v41 = vpop.f32.mrb[2].mxu0  ;;  %273 = vmax.xlane.f32.xlu0 %v272_v40  ;;  %1480 = vmatprep.subr.bf16.mxu0 %v1479_v32 }
 0x269   :  { %v658_v42 = vmul.f32 0.0625, %v654_v41  ;;  %v1414_v43 = vpop.f32.mrb[3].mxu0  ;;  %vm440_vm5 = vcmp.eq.f32.partialorder %v439_v38, 0.0  ;;  %1482 = vmatpush3.bf16.msra.mxu0 %v1479_v32 }
 0x26a   :  { %v441_v44 = vsel %vm440_vm5, 1e-10, %v439_v38 }
 0x26b   :  { %v659_v45 = vmul.f32 %v658_v42, %v580_v39  ;;  %v442_v46 = vsel %vm271_vm3, %v441_v44, -inf }
 0x26c   :  { %v824_v47 = vpop.f32.mrb[4].mxu0  ;;  %443 = vmax.xlane.f32.xlu1 %v442_v46 }
 0x26d   :  { %v828_v48 = vmul.f32 0.0625, %v824_v47  ;;  %v1424_v49 = vpop.f32.mrb[5].mxu0  ;;  %vm660_vm6 = vcmp.eq.f32.partialorder %v659_v45, 0.0  ;;  %v1322_v47 = vld [vmem:[#allocation8 + $0xa0] ss:$0 sm:$0xff] }
 0x26e   :  { %v661_v50 = vsel %vm660_vm6, 1e-10, %v659_v45 }
 0x26f   :  { %v829_v51 = vmul.f32 %v828_v48, %v580_v39  ;;  %v662_v52 = vsel %vm271_vm3, %v661_v50, -inf }
 0x270   :  { %663 = vmax.xlane.f32.xlu0 %v662_v52 }
 0x271   :  { %vm830_vm7 = vcmp.eq.f32.partialorder %v829_v51, 0.0 }
 0x272   :  { %v831_v53 = vsel %vm830_vm7, 1e-10, %v829_v51 }
 0x273   :  { %v832_v54 = vsel %vm271_vm3, %v831_v53, -inf }
 0x274   :  { %833 = vmax.xlane.f32.xlu0 %v832_v54 }
 0x27d   :  { %283 = vrot.lane.b32.xlu1 %v1743_v10, %s1660_s27 }
 0x2f5   :  { %v274_v55 = vpop.xlane.xlu0 %273 }
 0x2f6   :  { %v275_v56 = vsub.f32 %v270_v37, %v274_v55  ;;  %v1483_v37 = vpack.c.bf16 %v929_v35, %v928_v34  ;;  %v1157_v34 = vld [vmem:[#allocation8 + $0x90] sm:$0xff]  ;;  %v1158_v35 = vld [vmem:[#allocation8 + $0x98] sm:$0xff] }
 0x2f8   :  { %v276_v57 = vmul.f32 1.442695, %v275_v56  ;;  %1484 = vmatprep.subr.bf16.mxu0 %v1483_v37 }
 0x2f9   :  { %v444_v58 = vpop.xlane.xlu1 %443  ;;  %1486 = vmatpush3.bf16.msra.mxu0 %v1483_v37  ;;  %v1327_v37 = vld [vmem:[#allocation8 + $0xa1] ss:$0 sm:$0xff] }
 0x2fa   :  { %1529 = vpow2.f32 %v276_v57  ;;  %v445_v59 = vsub.f32 %v441_v44, %v444_v58 }
 0x2fc   :  { %v446_v60 = vmul.f32 1.442695, %v445_v59 }
 0x2fd   :  { %v284_v61 = vpop.permute.xlu1 %283  ;;  %v664_v62 = vpop.xlane.xlu0 %663 }
 0x2fe   :  { %1531 = vpow2.f32 %v446_v60  ;;  %v665_v63 = vsub.f32 %v661_v50, %v664_v62  ;;  %1396 = vmatpush3.msra.mxu1 %v284_v61 }
 0x2ff   :  { %1405 = vmatprep.subr.mxu1 %v1654_v8 }
 0x300   :  { %v666_v0 = vmul.f32 1.442695, %v665_v63 }
 0x301   :  { %v834_v1 = vpop.xlane.xlu0 %833 }
 0x302   :  { %1533 = vpow2.f32 %v666_v0  ;;  %v835_v2 = vsub.f32 %v831_v53, %v834_v1  ;;  %v1060_v1 = vld [vmem:[#allocation8 + $0x48] sm:$0xff] }
 0x304   :  { %v1530_v3 = vpop.eup %1529  ;;  %v836_v4 = vmul.f32 1.442695, %v835_v2 }
 0x305   :  { %v278_v6 = vsel %vm271_vm3, %v1530_v3, 0.0 }
 0x306   :  { %1535 = vpow2.f32 %v836_v4  ;;  %279 = vadd.xlane.f32.xlu1 %v278_v6  ;;  %v1062_v4 = vld [vmem:[#allocation8 + $0x58] sm:$0xff] }
 0x308   :  { %v1532_v11 = vpop.eup %1531 }
 0x309   :  { %v448_v12 = vsel %vm271_vm3, %v1532_v11, 0.0 }
 0x30a   :  { %449 = vadd.xlane.f32.xlu0 %v448_v12  ;;  %v1152_v12 = vld [vmem:[#allocation8 + $0x68] sm:$0xff] }
 0x30c   :  { %v1534_v13 = vpop.eup %1533 }
 0x30d   :  { %v668_v14 = vsel %vm271_vm3, %v1534_v13, 0.0 }
 0x30e   :  { %669 = vadd.xlane.f32.xlu1 %v668_v14 }
 0x310   :  { %v1536_v15 = vpop.eup %1535 }
 0x311   :  { %v838_v16 = vsel %vm271_vm3, %v1536_v15, 0.0 }
 0x312   :  { %839 = vadd.xlane.f32.xlu0 %v838_v16 }
 0x31f   :  { %673 = vrot.lane.b32.xlu1 %v1741_v9, %s1660_s27 }
 0x323   :  { %843 = vrot.lane.b32.xlu1 %v1741_v9, %s1661_s28 }
 0x328   :  { %453 = vrot.lane.b32.xlu0 %v1743_v10, %s1661_s28 }
 0x393   :  { %v280_v17 = vpop.xlane.xlu1 %279 }
 0x394   :  { %1537 = vrcp.f32 %v280_v17  ;;  %v1155_v17 = vld [vmem:[#allocation8 + $0x80] sm:$0xff] }
 0x397   :  { %v450_v18 = vpop.xlane.xlu0 %449 }
 0x398   :  { %1539 = vrcp.f32 %v450_v18  ;;  %v1156_v18 = vld [vmem:[#allocation8 + $0x88] sm:$0xff] }
 0x39b   :  { %v670_v19 = vpop.xlane.xlu1 %669 }
 0x39c   :  { %1541 = vrcp.f32 %v670_v19  ;;  %v1503_v19 = vpack.c.bf16 %v1156_v18, %v1155_v17 }
 0x39e   :  { %v1538_v20 = vpop.eup %1537 }
 0x39f   :  { %v282_v21 = vmul.f32 %v1538_v20, %v1530_v3  ;;  %v840_v22 = vpop.xlane.xlu0 %839  ;;  %v674_v9 = vpop.permute.xlu1 %673  ;;  %v1061_v3 = vld [vmem:[#allocation8 + $0x50] sm:$0xff] }
 0x3a0   :  { %1543 = vrcp.f32 %v840_v22  ;;  %v1491_v6 = vpack.c.bf16 %v1062_v4, %v1061_v3  ;;  %v1333_v3 = vld [vmem:[#allocation8 + $0xa5] ss:$0 sm:$0xff] }
 0x3a1   :  { %1398 = vmatmul.mubr.msk.f32.vlgmr.msra.gmra.mrb[4].mxu1 %vm271_vm3, %v282_v21 }
 0x3a2   :  { %v1540_v23 = vpop.eup %1539  ;;  %1407 = vmatprep.mubr.msk.f32.mxu1 %vm1655_vm1, %v1654_v8 }
 0x3a3   :  { %v452_v24 = vmul.f32 %v1540_v23, %v1532_v11  ;;  %v454_v25 = vpop.permute.xlu0 %453  ;;  %v844_v27 = vpop.permute.xlu1 %843  ;;  %v1151_v11 = vld [vmem:[#allocation8 + $0x60] sm:$0xff] }
 0x3a4   :  { %1406 = vmatpush3.msra.mxu1 %v454_v25  ;;  %v1495_v14 = vpack.c.bf16 %v1152_v12, %v1151_v11  ;;  %v1334_v12 = vld [vmem:[#allocation8 + $0xa6] ss:$0 sm:$0xff] }
 0x3a5   :  { %1408 = vmatmul.mubr.msk.f32.vlgmr.msra.gmra.mrb[6].mxu1 %vm271_vm3, %v452_v24  ;;  %1415 = vmatprep.subr.mxu1 %v1654_v8 }
 0x3a6   :  { %v1542_v10 = vpop.eup %1541  ;;  %1416 = vmatpush3.msra.mxu1 %v674_v9  ;;  %1417 = vmatprep.mubr.msk.f32.mxu1 %vm1655_vm1, %v1654_v8 }
 0x3a7   :  { %v672_v26 = vmul.f32 %v1542_v10, %v1534_v13  ;;  %1425 = vmatprep.subr.mxu1 %v1654_v8  ;;  %v1153_v13 = vld [vmem:[#allocation8 + $0x70] sm:$0xff]  ;;  %1496 = vmatprep.subr.bf16.mxu0 %v1495_v14  ;;  %v1325_v10 = vld [vmem:[#allocation8 + $0xa3] ss:$0 sm:$0xff] }
 0x3a9   :  { %1418 = vmatmul.mubr.msk.f32.vlgmr.msra.gmra.mrb[8].mxu1 %vm271_vm3, %v672_v26 }
 0x3aa   :  { %v1544_v28 = vpop.eup %1543  ;;  %1426 = vmatpush3.msra.mxu1 %v844_v27  ;;  %1427 = vmatprep.mubr.msk.f32.mxu1 %vm1655_vm1, %v1654_v8  ;;  %v1326_v27 = vld [vmem:[#allocation8 + $0xa4] ss:$0 sm:$0xff] }
 0x3ab   :  { %v842_v29 = vmul.f32 %v1544_v28, %v1536_v15  ;;  %v1154_v15 = vld [vmem:[#allocation8 + $0x78] sm:$0xff] }
 0x3ac   :  { %v1499_v16 = vpack.c.bf16 %v1154_v15, %v1153_v13 }
 0x3ad   :  { %1428 = vmatmul.mubr.msk.f32.vlgmr.msra.gmra.mrb[10].mxu1 %vm271_vm3, %v842_v29 }
 0x474   :  { %v355_v33 = vpop.f32.mrb[4].mxu1 }
 0x475   :  { %359 = vst.msk [vmem:[#allocation2] sm:$0xff] %vm192_vm2, %v355_v33  ;;  %v1399_v36 = vpop.f32.mrb[5].mxu1 }
 0x476   :  { %v1507_v36 = vpack.c.bf16 %v1158_v35, %v1157_v34 }
 0x478   :  { %v525_v38 = vpop.f32.mrb[6].mxu1 }
 0x479   :  { %530 = vrot.lane.b32.xlu0 %v525_v38, %s1651_s1  ;;  %v1409_v8 = vpop.f32.mrb[7].mxu1 }
 0x47c   :  { %v745_v39 = vpop.f32.mrb[8].mxu1 }
 0x47d   :  { %749 = vst.msk [vmem:[#allocation2 + $0x8] sm:$0xff] %vm192_vm2, %v745_v39  ;;  %v1419_v40 = vpop.f32.mrb[9].mxu1 }
 0x480   :  { %v915_v41 = vpop.f32.mrb[10].mxu1 }
 0x481   :  { %920 = vrot.lane.b32.xlu1 %v915_v41, %s1651_s1  ;;  %v1429_v42 = vpop.f32.mrb[11].mxu1 }
 0x4eb   :  { %v531_v43 = vpop.permute.xlu0 %530 }
 0x4ec   :  { %534 = vst.msk [vmem:[#allocation2] sm:$0xff] %vm533_vm8, %v531_v43  ;;  %v1330_v43 = vld [vmem:[#allocation8 + $0xa2] ss:$0 sm:$0xff] }
 0x4f3   :  { %v921_v44 = vpop.permute.xlu1 %920  ;;  %v924_v45 = vld [vmem:[#allocation2] sm:$0xff] }
 0x4f4   :  { %923 = vst.msk [vmem:[#allocation2 + $0x8] sm:$0xff] %vm533_vm8, %v921_v44  ;;  %1438 = vmatprep.mubr.msk.f32.mxu0 %vm62_vm0, %v924_v45 }
 0x4fb   :  { %v925_v46 = vld [vmem:[#allocation2 + $0x8] sm:$0xff] }
 0x4fc   :  { %1439 = vmatmul.mubr.msk.f32.vlgmr.msra.gmra.mrb[6].mxu0 %vm62_vm0, %v925_v46 }
 0x4fd   :  { %1498 = vmatpush3.bf16.msra.mxu0 %v1495_v14 }
 0x4fe   :  { %1500 = vmatprep.subr.bf16.mxu0 %v1499_v16 }
 0x501   :  { %1502 = vmatpush3.bf16.msra.mxu0 %v1499_v16 }
 0x502   :  { %1504 = vmatprep.subr.bf16.mxu0 %v1503_v19 }
 0x505   :  { %1506 = vmatpush3.bf16.msra.mxu0 %v1503_v19 }
 0x506   :  { %1508 = vmatprep.subr.bf16.mxu0 %v1507_v36 }
 0x509   :  { %1510 = vmatpush3.bf16.msra.mxu0 %v1507_v36 }
 0x5cf   :  { %v1440_v48 = vpop.f32.mrb[6].mxu0 }
 0x5d0   :  { %v1013_v49 = vadd.f32 %v1440_v48, %v1322_v47  ;;  %v1007_v50 = vpop.f32.mrb[7].mxu0 }
 0x5d1   :  { %v1008_v51 = vadd.f32 %v1322_v47, %v1007_v50 }
 0x5d2   :  { %v1017_v52 = vadd.f32 %v1013_v49, %v1731_v7 }
 0x5d3   :  { %v1016_v53 = vadd.f32 %v1008_v51, %v1727_v5  ;;  %v1059_v5 = vld [vmem:[#allocation8 + $0x40] sm:$0xff] }
 0x5d4   :  { %v1023_v54 = vsel %vm62_vm0, %v1017_v52, 0.0  ;;  %v1487_v2 = vpack.c.bf16 %v1060_v1, %v1059_v5 }
 0x5d5   :  { %1024 = vadd.xlane.f32.xlu1 %v1023_v54  ;;  %v1020_v55 = vsel %vm62_vm0, %v1016_v53, 0.0 }
 0x5d6   :  { %1021 = vadd.xlane.f32.xlu0 %v1020_v55  ;;  %1488 = vmatprep.subr.bf16.mxu1 %v1487_v2 }
 0x5d7   :  { %1490 = vmatpush3.bf16.msra.mxu1 %v1487_v2 }
 0x5d8   :  { %1492 = vmatprep.subr.bf16.mxu1 %v1491_v6 }
 0x5db   :  { %1494 = vmatpush3.bf16.msra.mxu1 %v1491_v6 }
 0x662   :  { %v1025_v56 = vpop.xlane.xlu1 %1024 }
 0x663   :  { %v1028_v57 = vmul.f32 0.03125, %v1025_v56  ;;  %v1022_v58 = vpop.xlane.xlu0 %1021 }
 0x664   :  { %v1027_v59 = vmul.f32 0.03125, %v1022_v58 }
 0x665   :  { %v1030_v60 = vsub.f32 %v1017_v52, %v1028_v57 }
 0x666   :  { %v1029_v61 = vsub.f32 %v1016_v53, %v1027_v59 }
 0x667   :  { %v1032_v0 = vmul.f32 %v1030_v60, %v1030_v60 }
 0x668   :  { %v1031_v62 = vmul.f32 %v1029_v61, %v1029_v61 }
 0x669   :  { %v1036_v7 = vsel %vm62_vm0, %v1032_v0, 0.0 }
 0x66a   :  { %v1033_v63 = vsel %vm62_vm0, %v1031_v62, 0.0 }
 0x66b   :  { %1034 = vadd.xlane.f32.xlu0 %v1033_v63 }
 0x66f   :  { %1037 = vadd.xlane.f32.xlu0 %v1036_v7 }
 0x6f8   :  { %v1035_v20 = vpop.xlane.xlu0 %1034 }
 0x6f9   :  { %v1039_v21 = vmul.f32 0.03125, %v1035_v20 }
 0x6fb   :  { %v1041_v22 = vadd.f32 1e-06, %v1039_v21 }
 0x6fc   :  { %v1038_v23 = vpop.xlane.xlu0 %1037 }
 0x6fd   :  { %1545 = vrsqrt.f32 %v1041_v22  ;;  %v1040_v24 = vmul.f32 0.03125, %v1038_v23 }
 0x6ff   :  { %v1042_v9 = vadd.f32 1e-06, %v1040_v24 }
 0x701   :  { %1547 = vrsqrt.f32 %v1042_v9 }
 0x707   :  { %v1546_v25 = vpop.eup %1545 }
 0x708   :  { %v1045_v26 = vmul.f32 %v1546_v25, %v1029_v61 }
 0x70a   :  { %v1051_v28 = vmul.f32 %v1325_v10, %v1045_v26 }
 0x70b   :  { %v1548_v29 = vpop.eup %1547 }
 0x70c   :  { %v1046_v30 = vmul.f32 %v1548_v29, %v1030_v60  ;;  %v1057_v31 = vadd.f32 %v1326_v27, %v1051_v28 }
 0x70e   :  { %v1052_v32 = vmul.f32 %v1325_v10, %v1046_v30  ;;  %1449 = vmatprep.mubr.msk.f32.mxu1 %vm62_vm0, %v1057_v31 }
 0x710   :  { %v1058_v33 = vadd.f32 %v1326_v27, %v1052_v32 }
 0x712   :  { %1450 = vmatmul.mubr.msk.f32.vlgmr.msra.gmra.mrb[12].mxu1 %vm62_vm0, %v1058_v33 }
 0x7e5   :  { %v1451_v38 = vpop.f32.mrb[12].mxu1 }
 0x7e6   :  { %v1146_v8 = vadd.f32 %v1451_v38, %v1327_v37  ;;  %v1140_v39 = vpop.f32.mrb[13].mxu1 }
 0x7e7   :  { %v1141_v40 = vadd.f32 %v1327_v37, %v1140_v39 }
 0x7e8   :  { %v1150_v42 = vmax.f32 %v1146_v8, 0.0 }
 0x7e9   :  { %v1149_v41 = vmax.f32 %v1141_v40, 0.0 }
 0x7eb   :  { %1468 = vmatprep.mubr.msk.f32.mxu0 %vm1164_vm9, %v1149_v41 }
 0x7ec   :  { %1469 = vmatmul.mubr.msk.f32.vlgmr.msra.gmra.mrb[8].mxu0 %vm1164_vm9, %v1150_v42 }
 0x8bf   :  { %v1470_v44 = vpop.f32.mrb[8].mxu0 }
 0x8c0   :  { %v1243_v45 = vadd.f32 %v1470_v44, %v1330_v43  ;;  %v1237_v46 = vpop.f32.mrb[9].mxu0 }
 0x8c1   :  { %v1238_v47 = vadd.f32 %v1330_v43, %v1237_v46 }
 0x8c2   :  { %v1247_v48 = vadd.f32 %v1243_v45, %v1058_v33 }
 0x8c3   :  { %v1246_v49 = vadd.f32 %v1238_v47, %v1057_v31 }
 0x8c4   :  { %v1253_v50 = vsel %vm62_vm0, %v1247_v48, 0.0 }
 0x8c5   :  { %1254 = vadd.xlane.f32.xlu0 %v1253_v50  ;;  %v1250_v51 = vsel %vm62_vm0, %v1246_v49, 0.0 }
 0x8c6   :  { %1251 = vadd.xlane.f32.xlu1 %v1250_v51 }
 0x952   :  { %v1255_v52 = vpop.xlane.xlu0 %1254 }
 0x953   :  { %v1257_v53 = vmul.f32 0.03125, %v1255_v52  ;;  %v1252_v54 = vpop.xlane.xlu1 %1251 }
 0x954   :  { %v1256_v55 = vmul.f32 0.03125, %v1252_v54 }
 0x955   :  { %v1259_v56 = vsub.f32 %v1247_v48, %v1257_v53 }
 0x956   :  { %v1258_v57 = vsub.f32 %v1246_v49, %v1256_v55 }
 0x957   :  { %v1261_v58 = vmul.f32 %v1259_v56, %v1259_v56 }
 0x958   :  { %v1260_v59 = vmul.f32 %v1258_v57, %v1258_v57 }
 0x959   :  { %v1265_v60 = vsel %vm62_vm0, %v1261_v58, 0.0 }
 0x95a   :  { %1266 = vadd.xlane.f32.xlu0 %v1265_v60  ;;  %v1262_v61 = vsel %vm62_vm0, %v1260_v59, 0.0 }
 0x95b   :  { %1263 = vadd.xlane.f32.xlu1 %v1262_v61 }
 0x9e7   :  { %v1267_v62 = vpop.xlane.xlu0 %1266 }
 0x9e8   :  { %v1269_v63 = vmul.f32 0.03125, %v1267_v62  ;;  %v1264_v0 = vpop.xlane.xlu1 %1263 }
 0x9e9   :  { %v1268_v7 = vmul.f32 0.03125, %v1264_v0 }
 0x9ea   :  { %v1271_v5 = vadd.f32 1e-06, %v1269_v63 }
 0x9eb   :  { %v1270_v1 = vadd.f32 1e-06, %v1268_v7 }
 0x9ec   :  { %1549 = vrsqrt.f32 %v1271_v5 }
 0x9ed   :  { %1551 = vrsqrt.f32 %v1270_v1 }
 0x9f6   :  { %v1550_v2 = vpop.eup %1549 }
 0x9f7   :  { %v1552_v4 = vpop.eup %1551  ;;  %v1275_v6 = vmul.f32 %v1550_v2, %v1259_v56 }
 0x9f8   :  { %v1274_v11 = vmul.f32 %v1552_v4, %v1258_v57 }
 0x9f9   :  { %v1281_v13 = vmul.f32 %v1333_v3, %v1275_v6 }
 0x9fa   :  { %v1280_v14 = vmul.f32 %v1333_v3, %v1274_v11 }
 0x9fb   :  { %v1287_v15 = vadd.f32 %v1334_v12, %v1281_v13 }
 0x9fc   :  { %v1286_v16 = vadd.f32 %v1334_v12, %v1280_v14 }
 0x9fd   :  { %1289 = vst.msk [vmem:[#allocation9 + $0x8] sm:$0xff] %vm62_vm0, %v1287_v15 }
 0x9fe   :  { %1288 = vst.msk [vmem:[#allocation9] sm:$0xff] %vm62_vm0, %v1286_v16 }
 0x9ff   :  { %1630 = shalt.err (!%p1627_p0)
}
 0xa00   :  { %s1631_s7 = scalar_lea.hbm %s1835_s3, 256 }
 0xa01   :  { %p1632_p1 = scmp.ne.s32.totalorder %s1835_s3, %s1631_s7  ;;  %p1635_p2 = scmp.lt.u32.totalorder %s1631_s7, %s1835_s3 }
 0xa03   :  { %p1637_p3 = pnand %p1635_p2, %p1632_p1 }
 0xa05   :  { %1640 = shalt.err (!%p1637_p3)
}
 0xa06   :  { %1301 = dma.vmem_to_hbm [thread:$0]  %s1296_s30, 256, %s1835_s3, [#allocation5], %s1648_s22, %s1648_s22, %s1649_s23  }
 0xa07   :  { %1645 = dma.done.wait [#allocation5], 256  }
 0xa08   :  { %1646 = vsyncadd [#allocation5], 4294967040 }
 0xa09   :  { %1305 = vsyncpa [#allocation4], 1 }
 0xa0a   :  { %1306 = vsyncpa [#allocation7], 1 }
 0xa0b   :  { %1307 = vsyncpa [#allocation5], 1 }

</bundles_post_ra>
